<compile_context>
chip_gen: v7x
topology: tpu7x:2x2x1
jax: 0.10.0
libtpu: 0.0.40
codegen_flags: <defaults>
</compile_context>

<pallas_src>
import functools

import jax
import jax.numpy as jnp
import numpy as np
from jax.experimental import pallas as pl
from jax.experimental.pallas import tpu as pltpu


def _propagator_kernel(adj_in_ref, adj_out_ref, ins_ref, outs_ref, curr_ref,
                       wa_in_ref, wa_out_ref, wc_rz_ref, wc_n_ref, b_ref,
                       out_ref, *, state_dim):
    D = state_dim
    f32 = jnp.float32

    # Adjacency arrives as bf16 (exact 0/1); upcast once and run f32 accumulation.
    adj_in = adj_in_ref[...].astype(f32)     # (Bt, N, NE)
    adj_out = adj_out_ref[...].astype(f32)   # (Bt, N, NE)
    ins = ins_ref[...]                       # (Bt, NE, D)
    outs = outs_ref[...]                     # (Bt, NE, D)
    curr = curr_ref[...]                     # (Bt, N, D)

    # Message aggregation (batched bmm over the batch tile; MXU).
    a_in = jnp.einsum('bnm,bmd->bnd', adj_in, ins,
                      preferred_element_type=f32)          # (Bt, N, D)
    a_out = jnp.einsum('bnm,bmd->bnd', adj_out, outs,
                       preferred_element_type=f32)         # (Bt, N, D)

    bt, n, _ = curr.shape
    m = bt * n
    a_in2 = a_in.reshape(m, D)
    a_out2 = a_out.reshape(m, D)
    curr2 = curr.reshape(m, D)

    wa_in = wa_in_ref[...]    # (D, 3D)  [r | z | n] columns, a_in rows
    wa_out = wa_out_ref[...]  # (D, 3D)  [r | z | n] columns, a_out rows
    wc_rz = wc_rz_ref[...]    # (D, 2D)  [r | z] columns, curr rows
    wc_n = wc_n_ref[...]      # (D, D)   n columns, (r*curr) rows
    b = b_ref[...]            # (1, 3D)  [br | bz | bn]

    # Fused gate matmuls (wider MXU pushes instead of 9 (M,D)x(D,D) calls).
    g_a = (jnp.dot(a_in2, wa_in, preferred_element_type=f32)
           + jnp.dot(a_out2, wa_out, preferred_element_type=f32))   # (M, 3D)
    g_c = jnp.dot(curr2, wc_rz, preferred_element_type=f32)         # (M, 2D)

    r = jax.nn.sigmoid(g_a[:, 0:D] + g_c[:, 0:D] + b[:, 0:D])
    z = jax.nn.sigmoid(g_a[:, D:2 * D] + g_c[:, D:2 * D] + b[:, D:2 * D])
    h_hat = jnp.tanh(g_a[:, 2 * D:3 * D]
                     + jnp.dot(r * curr2, wc_n, preferred_element_type=f32)
                     + b[:, 2 * D:3 * D])

    out = (1.0 - z) * curr2 + z * h_hat
    out_ref[...] = out.reshape(bt, n, D).astype(out_ref.dtype)


def propagator_forward(in_states, out_states, curr_state, adj_matrix, params,
                       *, num_nodes, num_edge_types, state_dim, batch_tile=None):
    B = curr_state.shape[0]
    N = num_nodes
    NE = num_nodes * num_edge_types
    D = state_dim

    # Fold several batch elements into one grid step to amortize per-step
    # pipeline overhead (keep batch_tile a divisor of B).
    if batch_tile is None:
        batch_tile = next(bt for bt in (8, 4, 2, 1) if B % bt == 0)
    bt = batch_tile
    assert B % bt == 0, "batch_tile must divide the batch size"

    wr, br, wz, bz, wn, bn = params
    wr_t, wz_t, wn_t = wr.T, wz.T, wn.T            # each (3D, D)
    # Column-wise fusion of the three gate weights (row blocks: a_in / a_out / curr).
    w_a_in = jnp.concatenate([wr_t[0:D], wz_t[0:D], wn_t[0:D]], axis=1)          # (D, 3D)
    w_a_out = jnp.concatenate([wr_t[D:2 * D], wz_t[D:2 * D], wn_t[D:2 * D]], axis=1)  # (D, 3D)
    w_c_rz = jnp.concatenate([wr_t[2 * D:], wz_t[2 * D:]], axis=1)               # (D, 2D)
    w_c_n = wn_t[2 * D:]                                                         # (D, D)
    b_all = jnp.concatenate([br, bz, bn]).reshape(1, 3 * D)                      # (1, 3D)

    # Split adjacency in the wrapper (tile-aligned DMAs, no in-kernel lane slice)
    # and cast to bf16: values are 0/1 so the cast is exact, HBM traffic halves.
    adj_in = adj_matrix[:, :, :NE].astype(jnp.bfloat16)
    adj_out = adj_matrix[:, :, NE:].astype(jnp.bfloat16)

    kernel = functools.partial(_propagator_kernel, state_dim=D)

    def batched(rows, cols):
        return pl.BlockSpec((bt, rows, cols), lambda b: (b, 0, 0))

    def const(shape):
        return pl.BlockSpec(shape, lambda b: (0, 0))

    flops = 2 * B * N * (2 * NE) * D + 2 * B * N * 9 * D * D
    transcendentals = 3 * B * N * D
    bytes_accessed = (
        (adj_in.size + adj_out.size) * 2
        + (in_states.size + out_states.size + curr_state.size) * 4
        + B * N * D * 4
        + (w_a_in.size + w_a_out.size + w_c_rz.size + w_c_n.size + b_all.size) * 4)

    return pl.pallas_call(
        kernel,
        out_shape=jax.ShapeDtypeStruct((B, N, D), jnp.float32),
        grid_spec=pltpu.PrefetchScalarGridSpec(
            num_scalar_prefetch=0,
            grid=(B // bt,),
            in_specs=[
                batched(N, NE),        # adj_in   (bf16)
                batched(N, NE),        # adj_out  (bf16)
                batched(NE, D),        # in_states
                batched(NE, D),        # out_states
                batched(N, D),         # curr_state
                const((D, 3 * D)),     # Wa_in
                const((D, 3 * D)),     # Wa_out
                const((D, 2 * D)),     # Wc_rz
                const((D, D)),         # Wc_n
                const((1, 3 * D)),     # b_all
            ],
            out_specs=batched(N, D),
        ),
        compiler_params=pltpu.CompilerParams(
            dimension_semantics=("parallel",)),
        cost_estimate=pl.CostEstimate(
            flops=flops,
            transcendentals=transcendentals,
            bytes_accessed=bytes_accessed),
    )(adj_in, adj_out, in_states, out_states, curr_state,
      w_a_in, w_a_out, w_c_rz, w_c_n, b_all)


def propagator_reference(in_states, out_states, curr_state, adj_matrix, params,
                         *, num_nodes, num_edge_types):
    """Pure-JAX reference mirroring the PyTorch forward exactly."""
    wr, br, wz, bz, wn, bn = params
    NE = num_nodes * num_edge_types
    adj_in = adj_matrix[:, :, :NE]
    adj_out = adj_matrix[:, :, NE:]
    a_in = jnp.einsum('bnm,bmd->bnd', adj_in, in_states)
    a_out = jnp.einsum('bnm,bmd->bnd', adj_out, out_states)
    a = jnp.concatenate((a_in, a_out), -1)
    gate_input = jnp.concatenate((a, curr_state), -1)
    r = jax.nn.sigmoid(gate_input @ wr.T + br)
    z = jax.nn.sigmoid(gate_input @ wz.T + bz)
    h_hat = jnp.tanh(jnp.concatenate((a, r * curr_state), -1) @ wn.T + bn)
    return (1 - z) * curr_state + z * h_hat


if __name__ == "__main__":
    # Small shapes consistent with the module.
    B, N, E, D = 2, 8, 2, 32
    NE = N * E

    key = jax.random.PRNGKey(0)
    keys = jax.random.split(key, 10)

    in_states = jax.random.normal(keys[0], (B, NE, D), jnp.float32)
    out_states = jax.random.normal(keys[1], (B, NE, D), jnp.float32)
    curr_state = jax.random.normal(keys[2], (B, N, D), jnp.float32)
    adj_matrix = (jax.random.uniform(keys[3], (B, N, 2 * NE)) < 0.3).astype(jnp.float32)

    # Deterministic parameter init (Linear(state_dim*3, state_dim) x 3).
    scale = 1.0 / np.sqrt(3 * D)
    wr = jax.random.uniform(keys[4], (D, 3 * D), jnp.float32, -scale, scale)
    br = jax.random.uniform(keys[5], (D,), jnp.float32, -scale, scale)
    wz = jax.random.uniform(keys[6], (D, 3 * D), jnp.float32, -scale, scale)
    bz = jax.random.uniform(keys[7], (D,), jnp.float32, -scale, scale)
    wn = jax.random.uniform(keys[8], (D, 3 * D), jnp.float32, -scale, scale)
    bn = jax.random.uniform(keys[9], (D,), jnp.float32, -scale, scale)
    params = (wr, br, wz, bz, wn, bn)

    out = propagator_forward(in_states, out_states, curr_state, adj_matrix,
                             params, num_nodes=N, num_edge_types=E, state_dim=D)
    out = jax.block_until_ready(out)

    ref = propagator_reference(in_states, out_states, curr_state, adj_matrix,
                               params, num_nodes=N, num_edge_types=E)
    np.testing.assert_allclose(np.asarray(out), np.asarray(ref),
                               rtol=1e-5, atol=1e-5)
    print("KERNEL_OK")
</pallas_src>

<mosaic_0001>
module attributes {stable_mosaic.version = 11 : i64} {
  func.func @_propagator_kernel(%arg0: i32, %arg1: memref<2x8x16xbf16, #tpu.memory_space<vmem>>, %arg2: memref<2x8x16xbf16, #tpu.memory_space<vmem>>, %arg3: memref<2x16x32xf32, #tpu.memory_space<vmem>>, %arg4: memref<2x16x32xf32, #tpu.memory_space<vmem>>, %arg5: memref<2x8x32xf32, #tpu.memory_space<vmem>>, %arg6: memref<32x96xf32, #tpu.memory_space<vmem>>, %arg7: memref<32x96xf32, #tpu.memory_space<vmem>>, %arg8: memref<32x64xf32, #tpu.memory_space<vmem>>, %arg9: memref<32x32xf32, #tpu.memory_space<vmem>>, %arg10: memref<1x96xf32, #tpu.memory_space<vmem>>, %arg11: memref<2x8x32xf32, #tpu.memory_space<vmem>>) attributes {dimension_semantics = [#tpu.dimension_semantics<parallel>], iteration_bounds = array<i64: 1>, scalar_prefetch = 0 : i64, scratch_operands = 0 : i64, tpu.core_type = #tpu.core_type<tc>, window_params = [{transform_indices = @transform_0, window_bounds = array<i64: 2, 8, 16>}, {transform_indices = @transform_1, window_bounds = array<i64: 2, 8, 16>}, {transform_indices = @transform_2, window_bounds = array<i64: 2, 16, 32>}, {transform_indices = @transform_3, window_bounds = array<i64: 2, 16, 32>}, {transform_indices = @transform_4, window_bounds = array<i64: 2, 8, 32>}, {pipeline_mode = #tpu.pipeline_mode<synchronous>, transform_indices = @transform_5, window_bounds = array<i64: 32, 96>}, {pipeline_mode = #tpu.pipeline_mode<synchronous>, transform_indices = @transform_6, window_bounds = array<i64: 32, 96>}, {pipeline_mode = #tpu.pipeline_mode<synchronous>, transform_indices = @transform_7, window_bounds = array<i64: 32, 64>}, {pipeline_mode = #tpu.pipeline_mode<synchronous>, transform_indices = @transform_8, window_bounds = array<i64: 32, 32>}, {pipeline_mode = #tpu.pipeline_mode<synchronous>, transform_indices = @transform_9, window_bounds = array<i64: 1, 96>}, {transform_indices = @transform_10, window_bounds = array<i64: 2, 8, 32>}]} {
    %c0 = arith.constant 0 : index
    %c0_0 = arith.constant 0 : index
    %c0_1 = arith.constant 0 : index
    %0 = vector.load %arg1[%c0, %c0_0, %c0_1] : memref<2x8x16xbf16, #tpu.memory_space<vmem>>, vector<2x8x16xbf16>
    %1 = arith.extf %0 : vector<2x8x16xbf16> to vector<2x8x16xf32>
    %c0_2 = arith.constant 0 : index
    %c0_3 = arith.constant 0 : index
    %c0_4 = arith.constant 0 : index
    %2 = vector.load %arg2[%c0_2, %c0_3, %c0_4] : memref<2x8x16xbf16, #tpu.memory_space<vmem>>, vector<2x8x16xbf16>
    %3 = arith.extf %2 : vector<2x8x16xbf16> to vector<2x8x16xf32>
    %c0_5 = arith.constant 0 : index
    %c0_6 = arith.constant 0 : index
    %c0_7 = arith.constant 0 : index
    %4 = vector.load %arg3[%c0_5, %c0_6, %c0_7] : memref<2x16x32xf32, #tpu.memory_space<vmem>>, vector<2x16x32xf32>
    %c0_8 = arith.constant 0 : index
    %c0_9 = arith.constant 0 : index
    %c0_10 = arith.constant 0 : index
    %5 = vector.load %arg4[%c0_8, %c0_9, %c0_10] : memref<2x16x32xf32, #tpu.memory_space<vmem>>, vector<2x16x32xf32>
    %c0_11 = arith.constant 0 : index
    %c0_12 = arith.constant 0 : index
    %c0_13 = arith.constant 0 : index
    %6 = vector.load %arg5[%c0_11, %c0_12, %c0_13] : memref<2x8x32xf32, #tpu.memory_space<vmem>>, vector<2x8x32xf32>
    "tpu.trace_start"() <{level = 10 : i32, message = "bnm,bmd->bnd"}> : () -> ()
    %cst = arith.constant dense<0.000000e+00> : vector<2x8x32xf32>
    %7 = tpu.matmul %1, %4, %cst {dimension_numbers = #tpu.dot_dimension_numbers<[2], [1], [1], [2], [0, 0, 0, 1, 1, 2], [0], [0]>} : vector<2x8x16xf32>, vector<2x16x32xf32>, vector<2x8x32xf32> -> vector<2x8x32xf32>
    %cst_14 = arith.constant dense<0.000000e+00> : vector<2x8x32xf32>
    %8 = tpu.matmul %3, %5, %cst_14 {dimension_numbers = #tpu.dot_dimension_numbers<[2], [1], [1], [2], [0, 0, 0, 1, 1, 2], [0], [0]>} : vector<2x8x16xf32>, vector<2x16x32xf32>, vector<2x8x32xf32> -> vector<2x8x32xf32>
    "tpu.trace_stop"() : () -> ()
    %9 = vector.shape_cast %7 : vector<2x8x32xf32> to vector<16x32xf32>
    %10 = vector.shape_cast %8 : vector<2x8x32xf32> to vector<16x32xf32>
    %11 = vector.shape_cast %6 : vector<2x8x32xf32> to vector<16x32xf32>
    %c0_15 = arith.constant 0 : index
    %c0_16 = arith.constant 0 : index
    %12 = vector.load %arg6[%c0_15, %c0_16] : memref<32x96xf32, #tpu.memory_space<vmem>>, vector<32x96xf32>
    %c0_17 = arith.constant 0 : index
    %c0_18 = arith.constant 0 : index
    %13 = vector.load %arg7[%c0_17, %c0_18] : memref<32x96xf32, #tpu.memory_space<vmem>>, vector<32x96xf32>
    %c0_19 = arith.constant 0 : index
    %c0_20 = arith.constant 0 : index
    %14 = vector.load %arg8[%c0_19, %c0_20] : memref<32x64xf32, #tpu.memory_space<vmem>>, vector<32x64xf32>
    %c0_21 = arith.constant 0 : index
    %c0_22 = arith.constant 0 : index
    %15 = vector.load %arg9[%c0_21, %c0_22] : memref<32x32xf32, #tpu.memory_space<vmem>>, vector<32x32xf32>
    %c0_23 = arith.constant 0 : index
    %c0_24 = arith.constant 0 : index
    %16 = vector.load %arg10[%c0_23, %c0_24] : memref<1x96xf32, #tpu.memory_space<vmem>>, vector<1x96xf32>
    %cst_25 = arith.constant dense<0.000000e+00> : vector<16x96xf32>
    %17 = tpu.matmul %9, %12, %cst_25 {dimension_numbers = #tpu.dot_dimension_numbers<[1], [0], [0], [1], [0, 0, 1, 1], [], []>} : vector<16x32xf32>, vector<32x96xf32>, vector<16x96xf32> -> vector<16x96xf32>
    %cst_26 = arith.constant dense<0.000000e+00> : vector<16x96xf32>
    %18 = tpu.matmul %10, %13, %cst_26 {dimension_numbers = #tpu.dot_dimension_numbers<[1], [0], [0], [1], [0, 0, 1, 1], [], []>} : vector<16x32xf32>, vector<32x96xf32>, vector<16x96xf32> -> vector<16x96xf32>
    %19 = arith.addf %17, %18 : vector<16x96xf32>
    %cst_27 = arith.constant dense<0.000000e+00> : vector<16x64xf32>
    %20 = tpu.matmul %11, %14, %cst_27 {dimension_numbers = #tpu.dot_dimension_numbers<[1], [0], [0], [1], [0, 0, 1, 1], [], []>} : vector<16x32xf32>, vector<32x64xf32>, vector<16x64xf32> -> vector<16x64xf32>
    %21 = vector.extract_strided_slice %19 {offsets = [0, 0], sizes = [16, 32], strides = [1, 1]} : vector<16x96xf32> to vector<16x32xf32>
    %22 = vector.extract_strided_slice %20 {offsets = [0, 0], sizes = [16, 32], strides = [1, 1]} : vector<16x64xf32> to vector<16x32xf32>
    %23 = arith.addf %21, %22 : vector<16x32xf32>
    %24 = vector.extract_strided_slice %16 {offsets = [0, 0], sizes = [1, 32], strides = [1, 1]} : vector<1x96xf32> to vector<1x32xf32>
    %25 = vector.broadcast %24 : vector<1x32xf32> to vector<16x32xf32>
    %26 = arith.addf %23, %25 : vector<16x32xf32>
    %27 = arith.negf %26 : vector<16x32xf32>
    %28 = math.exp %27 : vector<16x32xf32>
    %cst_28 = arith.constant 1.000000e+00 : f32
    %29 = vector.broadcast %cst_28 : f32 to vector<16x32xf32>
    %30 = arith.addf %29, %28 : vector<16x32xf32>
    %31 = arith.divf %29, %30 : vector<16x32xf32>
    %32 = vector.extract_strided_slice %19 {offsets = [0, 32], sizes = [16, 32], strides = [1, 1]} : vector<16x96xf32> to vector<16x32xf32>
    %33 = vector.extract_strided_slice %20 {offsets = [0, 32], sizes = [16, 32], strides = [1, 1]} : vector<16x64xf32> to vector<16x32xf32>
    %34 = arith.addf %32, %33 : vector<16x32xf32>
    %35 = vector.extract_strided_slice %16 {offsets = [0, 32], sizes = [1, 32], strides = [1, 1]} : vector<1x96xf32> to vector<1x32xf32>
    %36 = vector.broadcast %35 : vector<1x32xf32> to vector<16x32xf32>
    %37 = arith.addf %34, %36 : vector<16x32xf32>
    %38 = arith.negf %37 : vector<16x32xf32>
    %39 = math.exp %38 : vector<16x32xf32>
    %cst_29 = arith.constant 1.000000e+00 : f32
    %40 = vector.broadcast %cst_29 : f32 to vector<16x32xf32>
    %41 = arith.addf %40, %39 : vector<16x32xf32>
    %42 = arith.divf %40, %41 : vector<16x32xf32>
    %43 = vector.extract_strided_slice %19 {offsets = [0, 64], sizes = [16, 32], strides = [1, 1]} : vector<16x96xf32> to vector<16x32xf32>
    %44 = arith.mulf %31, %11 : vector<16x32xf32>
    %cst_30 = arith.constant dense<0.000000e+00> : vector<16x32xf32>
    %45 = tpu.matmul %44, %15, %cst_30 {dimension_numbers = #tpu.dot_dimension_numbers<[1], [0], [0], [1], [0, 0, 1, 1], [], []>} : vector<16x32xf32>, vector<32x32xf32>, vector<16x32xf32> -> vector<16x32xf32>
    %46 = arith.addf %43, %45 : vector<16x32xf32>
    %47 = vector.extract_strided_slice %16 {offsets = [0, 64], sizes = [1, 32], strides = [1, 1]} : vector<1x96xf32> to vector<1x32xf32>
    %48 = vector.broadcast %47 : vector<1x32xf32> to vector<16x32xf32>
    %49 = arith.addf %46, %48 : vector<16x32xf32>
    %50 = math.tanh %49 : vector<16x32xf32>
    %cst_31 = arith.constant 1.000000e+00 : f32
    %51 = vector.broadcast %cst_31 : f32 to vector<16x32xf32>
    %52 = arith.subf %51, %42 : vector<16x32xf32>
    %53 = arith.mulf %52, %11 : vector<16x32xf32>
    %54 = arith.mulf %42, %50 : vector<16x32xf32>
    %55 = arith.addf %53, %54 : vector<16x32xf32>
    %56 = vector.shape_cast %55 : vector<16x32xf32> to vector<2x8x32xf32>
    %c0_32 = arith.constant 0 : index
    %c0_33 = arith.constant 0 : index
    %c0_34 = arith.constant 0 : index
    %57 = vector.load %arg11[%c0_32, %c0_33, %c0_34] : memref<2x8x32xf32, #tpu.memory_space<vmem>>, vector<2x8x32xf32>
    tpu.vector_store %arg11[%c0_32, %c0_33, %c0_34], %56 {strides = array<i32>} : memref<2x8x32xf32, #tpu.memory_space<vmem>>, vector<2x8x32xf32>,
    return
  }
  func.func @transform_0(%arg0: i32) -> (i32, i32, i32) {
    %c0_i32 = arith.constant 0 : i32
    %c0_i32_0 = arith.constant 0 : i32
    %c0_i32_1 = arith.constant 0 : i32
    return %arg0, %c0_i32, %c0_i32_0 : i32, i32, i32
  }
  func.func @transform_1(%arg0: i32) -> (i32, i32, i32) {
    %c0_i32 = arith.constant 0 : i32
    %c0_i32_0 = arith.constant 0 : i32
    %c0_i32_1 = arith.constant 0 : i32
    return %arg0, %c0_i32, %c0_i32_0 : i32, i32, i32
  }
  func.func @transform_2(%arg0: i32) -> (i32, i32, i32) {
    %c0_i32 = arith.constant 0 : i32
    %c0_i32_0 = arith.constant 0 : i32
    %c0_i32_1 = arith.constant 0 : i32
    return %arg0, %c0_i32, %c0_i32_0 : i32, i32, i32
  }
  func.func @transform_3(%arg0: i32) -> (i32, i32, i32) {
    %c0_i32 = arith.constant 0 : i32
    %c0_i32_0 = arith.constant 0 : i32
    %c0_i32_1 = arith.constant 0 : i32
    return %arg0, %c0_i32, %c0_i32_0 : i32, i32, i32
  }
  func.func @transform_4(%arg0: i32) -> (i32, i32, i32) {
    %c0_i32 = arith.constant 0 : i32
    %c0_i32_0 = arith.constant 0 : i32
    %c0_i32_1 = arith.constant 0 : i32
    return %arg0, %c0_i32, %c0_i32_0 : i32, i32, i32
  }
  func.func @transform_5(%arg0: i32) -> (i32, i32) {
    %c0_i32 = arith.constant 0 : i32
    %c0_i32_0 = arith.constant 0 : i32
    %c0_i32_1 = arith.constant 0 : i32
    return %c0_i32, %c0_i32_0 : i32, i32
  }
  func.func @transform_6(%arg0: i32) -> (i32, i32) {
    %c0_i32 = arith.constant 0 : i32
    %c0_i32_0 = arith.constant 0 : i32
    %c0_i32_1 = arith.constant 0 : i32
    return %c0_i32, %c0_i32_0 : i32, i32
  }
  func.func @transform_7(%arg0: i32) -> (i32, i32) {
    %c0_i32 = arith.constant 0 : i32
    %c0_i32_0 = arith.constant 0 : i32
    %c0_i32_1 = arith.constant 0 : i32
    return %c0_i32, %c0_i32_0 : i32, i32
  }
  func.func @transform_8(%arg0: i32) -> (i32, i32) {
    %c0_i32 = arith.constant 0 : i32
    %c0_i32_0 = arith.constant 0 : i32
    %c0_i32_1 = arith.constant 0 : i32
    return %c0_i32, %c0_i32_0 : i32, i32
  }
  func.func @transform_9(%arg0: i32) -> (i32, i32) {
    %c0_i32 = arith.constant 0 : i32
    %c0_i32_0 = arith.constant 0 : i32
    %c0_i32_1 = arith.constant 0 : i32
    return %c0_i32, %c0_i32_0 : i32, i32
  }
  func.func @transform_10(%arg0: i32) -> (i32, i32, i32) {
    %c0_i32 = arith.constant 0 : i32
    %c0_i32_0 = arith.constant 0 : i32
    %c0_i32_1 = arith.constant 0 : i32
    return %arg0, %c0_i32, %c0_i32_0 : i32, i32, i32
  }
}

</mosaic_0001>

<bundles_post_ra>
// kernel: tpu_custom_call.1
= control target key start
LH: loop header
LB: loop body
LE: loop exit
PB: predicated region body
PF: predicated region fallthrough
CT: control target
= control target key end

     0   :  { %15 = vsyncpa [#allocation3], 0  ;;  %s1589_s0 = inlined_call_operand.hbm [shape: bf16[2,8,16], index: 0, kind: input, shape index: {}]   ;;  %s1590_s1 = inlined_call_operand.hbm [shape: bf16[2,8,16], index: 1, kind: input, shape index: {}]   ;;  %s1591_s2 = inlined_call_operand.hbm [shape: f32[2,16,32], index: 2, kind: input, shape index: {}]   ;;  %s1592_s3 = inlined_call_operand.hbm [shape: f32[2,16,32], index: 3, kind: input, shape index: {}]   ;;  %s1593_s4 = inlined_call_operand.hbm [shape: f32[2,8,32], index: 4, kind: input, shape index: {}]   ;;  %s1594_s5 = inlined_call_operand.hbm [shape: f32[32,96], index: 5, kind: input, shape index: {}]   ;;  %s1595_s6 = inlined_call_operand.hbm [shape: f32[32,96], index: 6, kind: input, shape index: {}]   ;;  %s1596_s7 = inlined_call_operand.hbm [shape: f32[32,64], index: 7, kind: input, shape index: {}]   ;;  %s1597_s8 = inlined_call_operand.hbm [shape: f32[32,32], index: 8, kind: input, shape index: {}]   ;;  %s1598_s9 = inlined_call_operand.vmem [shape: f32[1,96], index: 9, kind: input, shape index: {}]   ;;  %s1599_s10 = inlined_call_operand.hbm [shape: f32[2,8,32], index: 10, kind: output, shape index: {}]  }
   0x1   :  { %16 = vsyncpa [#allocation6], 0 }
   0x2   :  { %17 = vsyncpa [#allocation9], 0 }
   0x3   :  { %18 = vsyncpa [#allocation12], 0 }
   0x4   :  { %19 = vsyncpa [#allocation15], 0 }
   0x5   :  { %20 = vsyncpa [#allocation4], 0  ;;  %s1342_s13 = smov [#allocation5]   ;;  %s1110_s17 = scalar_lea.hbm %s1590_s1, 128 }
   0x6   :  { %s38_s14 = sshll.u32 %s1342_s13, 4  ;;  %p1111_p0 = scmp.ne.s32.totalorder %s1590_s1, %s1110_s17  ;;  %s39_s14 = int_to_ptr.vmem [resolvable:$true] %s38_s14 }
   0x7   :  { %p1114_p1 = scmp.lt.u32.totalorder %s1110_s17, %s1590_s1 }
   0x9   :  { %p1116_p2 = pnand %p1114_p1, %p1111_p0 }
   0xb   :  { %1119 = shalt.err (!%p1116_p2)
}
   0xc   :  { %s1120_s22 = scalar_lea.vmem %s39_s14, 128  ;;  %p1125_p4 = scmp.lt.s32.totalorder %s39_s14, %s39_s14 }
   0xd   :  { %p1121_p3 = scmp.ne.s32.totalorder %s39_s14, %s1120_s22  ;;  %p1126_p5 = scmp.lt.s32.totalorder %s1120_s22, %s1120_s22 }
   0xf   :  { %p1127_p6 = por %p1126_p5, %p1125_p4 }
  0x11   :  { %p1128_p7 = pnand %p1127_p6, %p1121_p3 }
  0x13   :  { %1131 = shalt.err (!%p1128_p7)
}
  0x14   :  { %s1343_s23 = smov 64   ;;  %s1344_s24 = smov 4  }
  0x15   :  { %44 = dma.hbm_to_vmem [thread:$0]  %s1590_s1, 128, %s39_s14, [#allocation6], %s1343_s23, %s1343_s23, %s1344_s24  }
  0x16   :  { %s1345_s27 = smov [#allocation8]   ;;  %s1346_s29 = smov [#allocation11]  }
  0x17   :  { %s62_s28 = sshll.u32 %s1345_s27, 4  ;;  %s86_s30 = sshll.u32 %s1346_s29, 4  ;;  %s63_s28 = int_to_ptr.vmem [resolvable:$true] %s62_s28  ;;  %s87_s30 = int_to_ptr.vmem [resolvable:$true] %s86_s30 }
  0x18   :  { %s1132_s13 = scalar_lea.hbm %s1592_s3, 512 }
  0x19   :  { %p1133_p8 = scmp.ne.s32.totalorder %s1592_s3, %s1132_s13  ;;  %p1136_p9 = scmp.lt.u32.totalorder %s1132_s13, %s1592_s3 }
  0x1b   :  { %p1138_p10 = pnand %p1136_p9, %p1133_p8 }
  0x1d   :  { %1141 = shalt.err (!%p1138_p10)
}
  0x1e   :  { %s1142_s1 = scalar_lea.vmem %s63_s28, 512  ;;  %p1147_p12 = scmp.lt.s32.totalorder %s63_s28, %s63_s28 }
  0x1f   :  { %p1143_p11 = scmp.ne.s32.totalorder %s63_s28, %s1142_s1  ;;  %p1148_p13 = scmp.lt.s32.totalorder %s1142_s1, %s1142_s1 }
  0x21   :  { %p1149_p0 = por %p1148_p13, %p1147_p12 }
  0x23   :  { %p1150_p1 = pnand %p1149_p0, %p1143_p11 }
  0x25   :  { %1153 = shalt.err (!%p1150_p1)
}
  0x26   :  { %s1347_s14 = smov 128   ;;  %s1348_s19 = smov 8  }
  0x27   :  { %68 = dma.hbm_to_vmem [thread:$0]  %s1592_s3, 512, %s63_s28, [#allocation9], %s1347_s14, %s1347_s14, %s1348_s19  }
  0x28   :  { %s1154_s26 = scalar_lea.hbm %s1594_s5, 512 }
  0x29   :  { %p1155_p2 = scmp.ne.s32.totalorder %s1594_s5, %s1154_s26  ;;  %p1158_p3 = scmp.lt.u32.totalorder %s1154_s26, %s1594_s5 }
  0x2b   :  { %p1160_p4 = pnand %p1158_p3, %p1155_p2 }
  0x2d   :  { %1163 = shalt.err (!%p1160_p4)
}
  0x2e   :  { %s1164_s13 = scalar_lea.vmem %s87_s30, 512  ;;  %p1169_p6 = scmp.lt.s32.totalorder %s87_s30, %s87_s30 }
  0x2f   :  { %p1165_p5 = scmp.ne.s32.totalorder %s87_s30, %s1164_s13  ;;  %p1170_p7 = scmp.lt.s32.totalorder %s1164_s13, %s1164_s13 }
  0x31   :  { %p1171_p8 = por %p1170_p7, %p1169_p6 }
  0x33   :  { %p1172_p9 = pnand %p1171_p8, %p1165_p5 }
  0x35   :  { %1175 = shalt.err (!%p1172_p9)
}
  0x36   :  { %92 = dma.hbm_to_vmem [thread:$0]  %s1594_s5, 512, %s87_s30, [#allocation12], %s1347_s14, %s1347_s14, %s1348_s19  }
  0x37   :  { %s1349_s15 = smov [#allocation14]   ;;  %s1350_s17 = smov [#allocation2]  }
  0x38   :  { %s110_s16 = sshll.u32 %s1349_s15, 4  ;;  %s26_s18 = sshll.u32 %s1350_s17, 4  ;;  %s111_s16 = int_to_ptr.vmem [resolvable:$true] %s110_s16  ;;  %s27_s18 = int_to_ptr.vmem [resolvable:$true] %s26_s18 }
  0x39   :  { %s1176_s21 = scalar_lea.hbm %s1596_s7, 512 }
  0x3a   :  { %p1177_p10 = scmp.ne.s32.totalorder %s1596_s7, %s1176_s21  ;;  %p1180_p11 = scmp.lt.u32.totalorder %s1176_s21, %s1596_s7 }
  0x3c   :  { %p1182_p12 = pnand %p1180_p11, %p1177_p10 }
  0x3e   :  { %1185 = shalt.err (!%p1182_p12)
}
  0x3f   :  { %s1186_s5 = scalar_lea.vmem %s111_s16, 512  ;;  %p1191_p0 = scmp.lt.s32.totalorder %s111_s16, %s111_s16 }
  0x40   :  { %p1187_p13 = scmp.ne.s32.totalorder %s111_s16, %s1186_s5  ;;  %p1192_p1 = scmp.lt.s32.totalorder %s1186_s5, %s1186_s5 }
  0x42   :  { %p1193_p2 = por %p1192_p1, %p1191_p0 }
  0x44   :  { %p1194_p3 = pnand %p1193_p2, %p1187_p13 }
  0x46   :  { %1197 = shalt.err (!%p1194_p3)
}
  0x47   :  { %116 = dma.hbm_to_vmem [thread:$0]  %s1596_s7, 512, %s111_s16, [#allocation15], %s1347_s14, %s1347_s14, %s1348_s19  }
  0x48   :  { %s1198_s13 = scalar_lea.hbm %s1589_s0, 128 }
  0x49   :  { %p1199_p4 = scmp.ne.s32.totalorder %s1589_s0, %s1198_s13  ;;  %p1202_p5 = scmp.lt.u32.totalorder %s1198_s13, %s1589_s0 }
  0x4b   :  { %p1204_p6 = pnand %p1202_p5, %p1199_p4 }
  0x4d   :  { %1207 = shalt.err (!%p1204_p6)
}
  0x4e   :  { %s1208_s1 = scalar_lea.vmem %s27_s18, 128  ;;  %p1213_p8 = scmp.lt.s32.totalorder %s27_s18, %s27_s18 }
  0x4f   :  { %p1209_p7 = scmp.ne.s32.totalorder %s27_s18, %s1208_s1  ;;  %p1214_p9 = scmp.lt.s32.totalorder %s1208_s1, %s1208_s1 }
  0x51   :  { %p1215_p10 = por %p1214_p9, %p1213_p8 }
  0x53   :  { %p1216_p11 = pnand %p1215_p10, %p1209_p7 }
  0x55   :  { %1219 = shalt.err (!%p1216_p11)
}
  0x56   :  { %32 = dma.hbm_to_vmem [thread:$0]  %s1589_s0, 128, %s27_s18, [#allocation3], %s1343_s23, %s1343_s23, %s1344_s24  }
  0x57   :  { %s1351_s20 = smov [#allocation7]   ;;  %s1352_s22 = smov [#allocation10]  }
  0x58   :  { %s50_s21 = sshll.u32 %s1351_s20, 4  ;;  %s74_s25 = sshll.u32 %s1352_s22, 4  ;;  %s51_s21 = int_to_ptr.vmem [resolvable:$true] %s50_s21  ;;  %s75_s25 = int_to_ptr.vmem [resolvable:$true] %s74_s25 }
  0x59   :  { %s1220_s5 = scalar_lea.hbm %s1591_s2, 512 }
  0x5a   :  { %p1221_p12 = scmp.ne.s32.totalorder %s1591_s2, %s1220_s5  ;;  %p1224_p13 = scmp.lt.u32.totalorder %s1220_s5, %s1591_s2 }
  0x5c   :  { %p1226_p0 = pnand %p1224_p13, %p1221_p12 }
  0x5e   :  { %1229 = shalt.err (!%p1226_p0)
}
  0x5f   :  { %s1230_s0 = scalar_lea.vmem %s51_s21, 512  ;;  %p1235_p2 = scmp.lt.s32.totalorder %s51_s21, %s51_s21 }
  0x60   :  { %p1231_p1 = scmp.ne.s32.totalorder %s51_s21, %s1230_s0  ;;  %p1236_p3 = scmp.lt.s32.totalorder %s1230_s0, %s1230_s0 }
  0x62   :  { %p1237_p4 = por %p1236_p3, %p1235_p2 }
  0x64   :  { %p1238_p5 = pnand %p1237_p4, %p1231_p1 }
  0x66   :  { %1241 = shalt.err (!%p1238_p5)
}
  0x67   :  { %56 = dma.hbm_to_vmem [thread:$0]  %s1591_s2, 512, %s51_s21, [#allocation6], %s1347_s14, %s1347_s14, %s1348_s19  }
  0x68   :  { %s1242_s28 = scalar_lea.hbm %s1593_s4, 256 }
  0x69   :  { %p1243_p6 = scmp.ne.s32.totalorder %s1593_s4, %s1242_s28  ;;  %p1246_p7 = scmp.lt.u32.totalorder %s1242_s28, %s1593_s4 }
  0x6b   :  { %p1248_p8 = pnand %p1246_p7, %p1243_p6 }
  0x6d   :  { %1251 = shalt.err (!%p1248_p8)
}
  0x6e   :  { %s1252_s16 = scalar_lea.vmem %s75_s25, 256  ;;  %p1257_p10 = scmp.lt.s32.totalorder %s75_s25, %s75_s25 }
  0x6f   :  { %p1253_p9 = scmp.ne.s32.totalorder %s75_s25, %s1252_s16  ;;  %p1258_p11 = scmp.lt.s32.totalorder %s1252_s16, %s1252_s16 }
  0x71   :  { %p1259_p12 = por %p1258_p11, %p1257_p10 }
  0x73   :  { %p1260_p13 = pnand %p1259_p12, %p1253_p9 }
  0x75   :  { %1263 = shalt.err (!%p1260_p13)
}
  0x76   :  { %80 = dma.hbm_to_vmem [thread:$0]  %s1593_s4, 256, %s75_s25, [#allocation9], %s1347_s14, %s1347_s14, %s1348_s19  }
  0x77   :  { %s1353_s21 = smov [#allocation13]   ;;  %s1354_s26 = smov [#allocation16]  }
  0x78   :  { %s98_s22 = sshll.u32 %s1353_s21, 4  ;;  %s122_s27 = sshll.u32 %s1354_s26, 4  ;;  %s99_s22 = int_to_ptr.vmem [resolvable:$true] %s98_s22  ;;  %s123_s27 = int_to_ptr.vmem [resolvable:$true] %s122_s27 }
  0x79   :  { %s1264_s29 = scalar_lea.hbm %s1595_s6, 512 }
  0x7a   :  { %p1265_p0 = scmp.ne.s32.totalorder %s1595_s6, %s1264_s29  ;;  %p1268_p1 = scmp.lt.u32.totalorder %s1264_s29, %s1595_s6 }
  0x7c   :  { %p1270_p2 = pnand %p1268_p1, %p1265_p0 }
  0x7e   :  { %1273 = shalt.err (!%p1270_p2)
}
  0x7f   :  { %s1274_s4 = scalar_lea.vmem %s99_s22, 512  ;;  %p1279_p4 = scmp.lt.s32.totalorder %s99_s22, %s99_s22 }
  0x80   :  { %p1275_p3 = scmp.ne.s32.totalorder %s99_s22, %s1274_s4  ;;  %p1280_p5 = scmp.lt.s32.totalorder %s1274_s4, %s1274_s4 }
  0x82   :  { %p1281_p6 = por %p1280_p5, %p1279_p4 }
  0x84   :  { %p1282_p7 = pnand %p1281_p6, %p1275_p3 }
  0x86   :  { %1285 = shalt.err (!%p1282_p7)
}
  0x87   :  { %104 = dma.hbm_to_vmem [thread:$0]  %s1595_s6, 512, %s99_s22, [#allocation12], %s1347_s14, %s1347_s14, %s1348_s19  }
  0x88   :  { %s1286_s28 = scalar_lea.hbm %s1597_s8, 512 }
  0x89   :  { %p1287_p8 = scmp.ne.s32.totalorder %s1597_s8, %s1286_s28  ;;  %p1290_p9 = scmp.lt.u32.totalorder %s1286_s28, %s1597_s8 }
  0x8b   :  { %p1292_p10 = pnand %p1290_p9, %p1287_p8 }
  0x8d   :  { %1295 = shalt.err (!%p1292_p10)
}
  0x8e   :  { %s1296_s16 = scalar_lea.vmem %s123_s27, 512  ;;  %p1301_p12 = scmp.lt.s32.totalorder %s123_s27, %s123_s27 }
  0x8f   :  { %p1297_p11 = scmp.ne.s32.totalorder %s123_s27, %s1296_s16  ;;  %p1302_p13 = scmp.lt.s32.totalorder %s1296_s16, %s1296_s16 }
  0x91   :  { %p1303_p0 = por %p1302_p13, %p1301_p12 }
  0x93   :  { %p1304_p1 = pnand %p1303_p0, %p1297_p11 }
  0x95   :  { %1307 = shalt.err (!%p1304_p1)
}
  0x96   :  { %128 = dma.hbm_to_vmem [thread:$0]  %s1597_s8, 512, %s123_s27, [#allocation15], %s1347_s14, %s1347_s14, %s1348_s19  }
  0x97   :  { %1330 = dma.done.wait [#allocation3], 128  }
  0x98   :  { %1331 = vsyncadd [#allocation3], 4294967168 }
  0x99   :  { %1332 = dma.done.wait [#allocation6], 640  }
  0x9a   :  { %1333 = vsyncadd [#allocation6], 4294966656 }
  0x9b   :  { %1334 = dma.done.wait [#allocation9], 768  }
  0x9c   :  { %1335 = vsyncadd [#allocation9], 4294966528 }
  0x9d   :  { %1336 = dma.done.wait [#allocation12], 1024  }
  0x9e   :  { %1337 = vsyncadd [#allocation12], 4294966272 }
  0x9f   :  { %1338 = dma.done.wait [#allocation15], 1024  }
  0xa0   :  { %1339 = vsyncadd [#allocation15], 4294966272  ;;  %v1355_v0 = vmov 0.0|0.0   ;;  %vm1356_vm0 = vmmov 0   ;;  %v1357_v1 = vmov 0.0   ;;  %v166_v2 = vld [vmem:[#allocation7] sm:$0xff] }
  0xa1   :  { %1033 = vmatprep.subr.bf16.mxu0 %v1355_v0  ;;  %1036 = vmatprep.subr.bf16.mxu1 %v1355_v0  ;;  %v167_v3 = vld [vmem:[#allocation7 + $0x8] sm:$0xff]  ;;  %v168_v4 = vld [vmem:[#allocation7 + $0x10] sm:$0xff]  ;;  %v169_v6 = vld [vmem:[#allocation7 + $0x18] sm:$0xff]  ;;  %vm176_vm1 = vcmask 130048   ;;  %vm486_vm2 = vcmask 261120   ;;  %s1358_s8 = smov 32  }
  0xa2   :  { %965 = vmatprep.mubr.msk.f32.mxu0 %vm1356_vm0, %v1357_v1  ;;  %972 = vmatprep.mubr.msk.f32.mxu1 %vm1356_vm0, %v1357_v1  ;;  %v1034_v5 = vpack.c.bf16 %v167_v3, %v166_v2  ;;  %v918_v7 = vld [vmem:[#allocation2] sm:$0xff]   ;;  %v170_v8 = vld [vmem:[#allocation8] sm:$0xff]  ;;  %v1037_v9 = vpack.c.bf16 %v169_v6, %v168_v4  ;;  %v171_v11 = vld [vmem:[#allocation8 + $0x8] sm:$0xff] }
  0xa3   :  { %v919_v10 = vunpack.c.l.bf16 %v918_v7  ;;  %v172_v12 = vld [vmem:[#allocation8 + $0x10] sm:$0xff]  ;;  %v173_v13 = vld [vmem:[#allocation8 + $0x18] sm:$0xff]  ;;  %v920_v14 = vunpack.c.h.bf16 %v918_v7  ;;  %v1040_v15 = vpack.c.bf16 %v171_v11, %v170_v8  ;;  %v475_v23 = vld [vmem:[#allocation13 + $0x10] sm:$0xff] }
  0xa4   :  { %1035 = vmatpush3.bf16.msra.mxu0 %v1034_v5  ;;  %v922_v16 = vld [vmem:[#allocation5] sm:$0xff]   ;;  %v473_v17 = vld [vmem:[#allocation13] sm:$0xff]  ;;  %1038 = vmatpush3.bf16.msra.mxu1 %v1037_v9  ;;  %v1043_v19 = vpack.c.bf16 %v173_v13, %v172_v12  ;;  %v476_v24 = vld [vmem:[#allocation13 + $0x18] sm:$0xff] }
  0xa5   :  { %v474_v18 = vld [vmem:[#allocation13 + $0x8] sm:$0xff]  ;;  %1039 = vmatprep.subr.bf16.mxu0 %v1355_v0  ;;  %1042 = vmatprep.subr.bf16.mxu1 %v1355_v0  ;;  %v923_v21 = vunpack.c.l.bf16 %v922_v16  ;;  %v924_v22 = vunpack.c.h.bf16 %v922_v16  ;;  %v1049_v25 = vpack.c.bf16 %v476_v24, %v475_v23  ;;  %v477_v26 = vld [vmem:[#allocation14] sm:$0xff]  ;;  %v479_v32 = vld [vmem:[#allocation14 + $0x10] sm:$0xff] }
  0xa6   :  { %v1045_v20 = vpack.c.bf16 %v474_v18, %v473_v17  ;;  %v478_v27 = vld [vmem:[#allocation14 + $0x8] sm:$0xff]  ;;  %v469_v28 = vld [vmem:[#allocation11] sm:$0xff]  ;;  %v480_v33 = vld [vmem:[#allocation14 + $0x18] sm:$0xff] }
  0xa7   :  { %966 = vmatmul.mubr.msk.f32.vlgmr.msra.gmra.mrb[0].mxu0 %vm176_vm1, %v919_v10  ;;  %973 = vmatmul.mubr.msk.f32.vlgmr.msra.gmra.mrb[0].mxu1 %vm176_vm1, %v920_v14  ;;  %v470_v29 = vld [vmem:[#allocation11 + $0x8] sm:$0xff]  ;;  %v1061_v30 = vpack.c.bf16 %v478_v27, %v477_v26  ;;  %v1065_v34 = vpack.c.bf16 %v480_v33, %v479_v32  ;;  %v174_v35 = vld [vmem:[#allocation10] sm:$0xff]  ;;  %v175_v36 = vld [vmem:[#allocation10 + $0x8] sm:$0xff] }
  0xa8   :  { %1041 = vmatpush3.bf16.msra.mxu0 %v1040_v15  ;;  %1044 = vmatpush3.bf16.msra.mxu1 %v1043_v19  ;;  %v1053_v31 = vpack.c.bf16 %v470_v29, %v469_v28  ;;  %v471_v40 = vld [vmem:[#allocation11 + $0x10] sm:$0xff]  ;;  %v472_v41 = vld [vmem:[#allocation11 + $0x18] sm:$0xff]  ;;  %v481_v50 = vld [vmem:[#allocation16] sm:$0xff] }
  0xa9   :  { %979 = vmatprep.mubr.msk.f32.mxu0 %vm1356_vm0, %v1357_v1  ;;  %986 = vmatprep.mubr.msk.f32.mxu1 %vm1356_vm0, %v1357_v1  ;;  %v1057_v44 = vpack.c.bf16 %v472_v41, %v471_v40  ;;  %v482_v51 = vld [vmem:[#allocation16 + $0x8] sm:$0xff]  ;;  %v483_v53 = vld [vmem:[#allocation16 + $0x10] sm:$0xff]  ;;  %v484_v54 = vld [vmem:[#allocation16 + $0x18] sm:$0xff] }
  0xaa   :  { %1046 = vmatprep.subr.bf16.mxu0 %v1045_v20  ;;  %1062 = vmatprep.subr.bf16.mxu1 %v1061_v30  ;;  %v1069_v52 = vpack.c.bf16 %v482_v51, %v481_v50  ;;  %v1073_v55 = vpack.c.bf16 %v484_v54, %v483_v53  ;;  %v912_v57 = vld [vmem:[%s1598_s9] ss:$0 sm:$0xff]  ;;  %s1359_s9 = smov 96  }
  0xab   :  { %980 = vmatmul.mubr.msk.f32.vlgmr.msra.gmra.mrb[2].mxu0 %vm176_vm1, %v923_v21  ;;  %987 = vmatmul.mubr.msk.f32.vlgmr.msra.gmra.mrb[2].mxu1 %vm176_vm1, %v924_v22 }
  0xac   :  { %1048 = vmatpush3.bf16.msra.mxu0 %v1045_v20  ;;  %1064 = vmatpush3.bf16.msra.mxu1 %v1061_v30 }
  0xad   :  { %1050 = vmatprep.subr.bf16.mxu0 %v1049_v25  ;;  %1066 = vmatprep.subr.bf16.mxu1 %v1065_v34 }
  0xae   :  { %1019 = vmatprep.mubr.msk.f32.mxu1 %vm486_vm2, %v174_v35  ;;  %851 = vrot.lane.b32.xlu1 %v174_v35, %s1358_s8 }
  0xb0   :  { %1052 = vmatpush3.bf16.msra.mxu0 %v1049_v25  ;;  %1068 = vmatpush3.bf16.msra.mxu1 %v1065_v34 }
  0xb1   :  { %1054 = vmatprep.subr.bf16.mxu0 %v1053_v31  ;;  %1070 = vmatprep.subr.bf16.mxu1 %v1069_v52 }
  0xb2   :  { %853 = vrot.lane.b32.xlu1 %v175_v36, %s1358_s8 }
  0xb3   :  { %1020 = vmatmul.mubr.msk.f32.vlgmr.msra.gmra.mrb[4].mxu1 %vm486_vm2, %v175_v36 }
  0xb4   :  { %1072 = vmatpush3.bf16.msra.mxu1 %v1069_v52 }
  0xb5   :  { %1074 = vmatprep.subr.bf16.mxu1 %v1073_v55 }
  0xb8   :  { %1076 = vmatpush3.bf16.msra.mxu1 %v1073_v55 }
 0x120   :  { %v852_v19 = vpop.permute.xlu1 %851 }
 0x124   :  { %v854_v21 = vpop.permute.xlu1 %853 }
 0x17a   :  { %v246_v37 = vpop.f32.mrb[0].mxu0  ;;  %v319_v39 = vpop.f32.mrb[0].mxu1 }
 0x17b   :  { %v967_v38 = vpop.f32.mrb[1].mxu0  ;;  %v974_v42 = vpop.f32.mrb[1].mxu1 }
 0x17e   :  { %v392_v43 = vpop.f32.mrb[2].mxu0  ;;  %v465_v46 = vpop.f32.mrb[2].mxu1 }
 0x17f   :  { %v981_v45 = vpop.f32.mrb[3].mxu0  ;;  %997 = vmatprep.mubr.msk.f32.mxu0 %vm486_vm2, %v392_v43  ;;  %v988_v47 = vpop.f32.mrb[3].mxu1 }
 0x180   :  { %998 = vmatmul.mubr.msk.f32.vlgmr.msra.gmra.mrb[4].mxu0 %vm486_vm2, %v465_v46 }
 0x181   :  { %1056 = vmatpush3.bf16.msra.mxu0 %v1053_v31  ;;  %1008 = vmatprep.mubr.msk.f32.mxu0 %vm486_vm2, %v246_v37 }
 0x182   :  { %1058 = vmatprep.subr.bf16.mxu0 %v1057_v44 }
 0x185   :  { %1060 = vmatpush3.bf16.msra.mxu0 %v1057_v44 }
 0x186   :  { %v1021_v48 = vpop.f32.mrb[4].mxu1 }
 0x187   :  { %v721_v49 = vpop.f32.mrb[5].mxu1 }
 0x188   :  { %1009 = vmatmul.mubr.msk.f32.vlgmr.msra.gmra.mrb[4].mxu0 %vm486_vm2, %v319_v39 }
 0x25b   :  { %v1010_v56 = vpop.f32.mrb[4].mxu0 }
 0x25c   :  { %v731_v58 = vadd.f32 %v1021_v48, %v1010_v56  ;;  %v640_v59 = vpop.f32.mrb[5].mxu0 }
 0x25d   :  { %v730_v60 = vadd.f32 %v721_v49, %v640_v59 }
 0x25e   :  { %v739_v61 = vadd.f32 %v912_v57, %v731_v58 }
 0x25f   :  { %v738_v62 = vadd.f32 %v912_v57, %v730_v60 }
 0x260   :  { %v914_v63 = vmul.f32 -1.442695, %v739_v61 }
 0x261   :  { %v913_v0 = vmul.f32 -1.442695, %v738_v62 }
 0x262   :  { %1098 = vpow2.f32 %v914_v63 }
 0x263   :  { %1100 = vpow2.f32 %v913_v0 }
 0x26c   :  { %v1099_v1 = vpop.eup %1098 }
 0x26d   :  { %v1101_v2 = vpop.eup %1100  ;;  %v747_v3 = vadd.f32 1.0, %v1099_v1 }
 0x26e   :  { %v746_v4 = vadd.f32 1.0, %v1101_v2 }
 0x26f   :  { %1102 = vrcp.f32 %v747_v3 }
 0x270   :  { %1104 = vrcp.f32 %v746_v4 }
 0x279   :  { %v1103_v5 = vpop.eup %1102 }
 0x27a   :  { %v1105_v6 = vpop.eup %1104  ;;  %v753_v8 = vmul.f32 %v1103_v5, %v175_v36  ;;  %v850_v24 = vsub.f32 1.0, %v1103_v5 }
 0x27b   :  { %v752_v7 = vmul.f32 %v1105_v6, %v174_v35  ;;  %v849_v20 = vsub.f32 1.0, %v1105_v6 }
 0x27c   :  { %v858_v28 = vmul.f32 %v854_v21, %v850_v24 }
 0x27d   :  { %1030 = vmatprep.mubr.msk.f32.mxu1 %vm486_vm2, %v752_v7  ;;  %v857_v23 = vmul.f32 %v852_v19, %v849_v20 }
 0x27e   :  { %1031 = vmatmul.mubr.msk.f32.vlgmr.msra.gmra.mrb[6].mxu1 %vm486_vm2, %v753_v8 }
 0x351   :  { %v1032_v9 = vpop.f32.mrb[6].mxu1 }
 0x352   :  { %v826_v10 = vpop.f32.mrb[7].mxu1 }
 0x353   :  { %837 = vrot.lane.b32.xlu0 %v826_v10, %s1343_s23 }
 0x357   :  { %839 = vrot.lane.b32.xlu0 %v1032_v9, %s1343_s23  ;;  %s1360_s23 = smov [#allocation17]  }
 0x358   :  { %s886_s22 = sshll.u32 %s1360_s23, 4  ;;  %s887_s22 = int_to_ptr.vmem [resolvable:$true] %s886_s22 }
 0x359   :  { %s1308_s26 = scalar_lea.vmem %s887_s22, 256  ;;  %p1313_p3 = scmp.lt.s32.totalorder %s887_s22, %s887_s22 }
 0x35a   :  { %p1309_p2 = scmp.ne.s32.totalorder %s887_s22, %s1308_s26  ;;  %p1314_p4 = scmp.lt.s32.totalorder %s1308_s26, %s1308_s26 }
 0x35c   :  { %p1315_p5 = por %p1314_p4, %p1313_p3 }
 0x35e   :  { %p1316_p6 = pnand %p1315_p5, %p1309_p2 }
 0x3c5   :  { %v838_v11 = vpop.permute.xlu0 %837 }
 0x3c6   :  { %v843_v12 = vadd.f32 %v838_v11, %v640_v59 }
 0x3c8   :  { %v845_v13 = vadd.f32 %v912_v57, %v843_v12 }
 0x3c9   :  { %v840_v14 = vpop.permute.xlu0 %839 }
 0x3ca   :  { %1106 = vtanh.f32 %v845_v13  ;;  %v844_v15 = vadd.f32 %v1010_v56, %v840_v14 }
 0x3cc   :  { %v846_v16 = vadd.f32 %v912_v57, %v844_v15 }
 0x3ce   :  { %1108 = vtanh.f32 %v846_v16 }
 0x3d4   :  { %v1107_v17 = vpop.eup %1106 }
 0x3d5   :  { %861 = vrot.lane.b32.xlu0 %v1107_v17, %s1359_s9 }
 0x3d8   :  { %v1109_v18 = vpop.eup %1108 }
 0x3d9   :  { %863 = vrot.lane.b32.xlu1 %v1109_v18, %s1359_s9 }
 0x447   :  { %v862_v22 = vpop.permute.xlu0 %861 }
 0x448   :  { %v867_v25 = vmul.f32 %v1105_v6, %v862_v22 }
 0x44a   :  { %v869_v26 = vadd.f32 %v867_v25, %v857_v23 }
 0x44b   :  { %v864_v27 = vpop.permute.xlu1 %863 }
 0x44c   :  { %v868_v29 = vmul.f32 %v1103_v5, %v864_v27  ;;  %873 = vrot.lane.b32.xlu0 %v869_v26, %s1359_s9 }
 0x44e   :  { %v870_v30 = vadd.f32 %v868_v29, %v858_v28 }
 0x450   :  { %875 = vrot.lane.b32.xlu1 %v870_v30, %s1359_s9 }
 0x4be   :  { %v874_v31 = vpop.permute.xlu0 %873 }
 0x4bf   :  { %879 = vst.msk [vmem:[#allocation17] sm:$0xff] %vm486_vm2, %v874_v31 }
 0x4c2   :  { %v876_v32 = vpop.permute.xlu1 %875 }
 0x4c3   :  { %880 = vst.msk [vmem:[#allocation17 + $0x8] sm:$0xff] %vm486_vm2, %v876_v32 }
 0x4c4   :  { %1319 = shalt.err (!%p1316_p6)
}
 0x4c5   :  { %s1320_s30 = scalar_lea.hbm %s1599_s10, 256 }
 0x4c6   :  { %p1321_p7 = scmp.ne.s32.totalorder %s1599_s10, %s1320_s30  ;;  %p1324_p8 = scmp.lt.u32.totalorder %s1320_s30, %s1599_s10 }
 0x4c8   :  { %p1326_p9 = pnand %p1324_p8, %p1321_p7 }
 0x4ca   :  { %1329 = shalt.err (!%p1326_p9)
}
 0x4cb   :  { %892 = dma.vmem_to_hbm [thread:$0]  %s887_s22, 256, %s1599_s10, [#allocation4], %s1347_s14, %s1347_s14, %s1348_s19  }
 0x4cc   :  { %1340 = dma.done.wait [#allocation4], 256  }
 0x4cd   :  { %1341 = vsyncadd [#allocation4], 4294967040 }
 0x4ce   :  { %896 = vsyncpa [#allocation3], 1 }
 0x4cf   :  { %897 = vsyncpa [#allocation6], 1 }
 0x4d0   :  { %898 = vsyncpa [#allocation9], 1 }
 0x4d1   :  { %899 = vsyncpa [#allocation12], 1 }
 0x4d2   :  { %900 = vsyncpa [#allocation15], 1 }
 0x4d3   :  { %901 = vsyncpa [#allocation4], 1 }

</bundles_post_ra>
